<compile_context>
chip_gen: v6e
topology: v6e:2x2x1
jax: 0.10.0
libtpu: 0.0.40
codegen_flags: <defaults>
</compile_context>

<pallas_src>
import numpy as np

import jax
import jax.numpy as jnp
from jax.experimental import pallas as pl
from jax.experimental.pallas import tpu as pltpu


def _resblock_kernel(x_ref, sdn_ref, sup_ref, b1_ref, bias1_ref,
                     b2_ref, bias2_ref, o_ref):
    # x_ref / o_ref  : (N*H, W*C)   lane-dense activations (rows = image rows)
    # sdn_ref/sup_ref: (N*H, N*H)   0/1 row-shift matrices (image-local +-1 row)
    # b*_ref         : (3, W*C, W*C) block-tridiagonal conv-row matrices
    # bias*_ref      : (1, W*C)     conv bias tiled across W
    x = x_ref[...]
    sdn = sdn_ref[...]
    sup = sup_ref[...]

    def mm(a, b):
        # default precision (single/low-pass MXU); f32 accumulate
        return jnp.dot(a, b, preferred_element_type=jnp.float32)

    def conv3x3(a, b_ref, bias_ref):
        dn = mm(sdn, a)                 # dn[r] = a[r-1], 0 at top row of image
        up = mm(sup, a)                 # up[r] = a[r+1], 0 at bottom row
        return (bias_ref[...]           # bias as accumulator init
                + mm(dn, b_ref[0])      # kernel row ky = 0  (uses row h-1)
                + mm(a,  b_ref[1])      # kernel row ky = 1  (row h)
                + mm(up, b_ref[2]))     # kernel row ky = 2  (row h+1)

    h = jnp.maximum(conv3x3(x, b1_ref, bias1_ref), 0.0)   # in/mid masks folded
    h = jnp.maximum(conv3x3(h, b2_ref, bias2_ref), 0.0)   # out mask folded
    o_ref[...] = jnp.maximum(h + x, 0.0)                  # identity shortcut


def _fold_row_mats(w9, width):
    """w9: (3, 3, C, C) tap weights -> (3, W*C, W*C) row matrices that apply
    the 3 horizontal taps + channel mix in a single right-matmul per ky."""
    c = w9.shape[-1]
    mats = []
    for ky in range(3):
        b = jnp.zeros((width * c, width * c), jnp.float32)
        for kx in range(3):
            # output column w pulls from input column w + (kx - 1);
            # out-of-range columns simply have no entry (zero padding).
            shift = jnp.eye(width, k=1 - kx, dtype=jnp.float32)
            b = b + jnp.kron(shift, w9[ky, kx])
        mats.append(b)
    return jnp.stack(mats)                       # (3, W*C, W*C)


def _row_shift_mats(n, h):
    """(N*H, N*H) 0/1 matrices: S_dn @ a reads row-1, S_up @ a reads row+1,
    with zeros at per-image boundaries (no cross-image bleed)."""
    eye_n = jnp.eye(n, dtype=jnp.float32)
    s_dn = jnp.kron(eye_n, jnp.eye(h, k=-1, dtype=jnp.float32))
    s_up = jnp.kron(eye_n, jnp.eye(h, k=+1, dtype=jnp.float32))
    return s_dn, s_up


def resblock64_with_mask(x_nhwc, params):
    """Runs the fused residual block. x_nhwc: (N, H, W, C) float32."""
    N, H, W, C = x_nhwc.shape
    w_in, c1w, c1b, w_mid, c2w, c2b, w_out = params

    # --- host-side (trace-time) ResRep folding of the 1x1 compactor masks ---
    w1 = jnp.einsum('ij,yxjk,kl->yxil', w_in, c1w, w_mid)   # (3,3,C,C)
    b1 = c1b @ w_mid                                        # (C,)
    w2 = jnp.einsum('yxjk,kl->yxjl', c2w, w_out)            # (3,3,C,C)
    b2 = c2b @ w_out

    # --- fold horizontal taps + channel mix into lane-dense row matrices ---
    B1 = _fold_row_mats(w1.astype(jnp.float32), W)          # (3, W*C, W*C)
    B2 = _fold_row_mats(w2.astype(jnp.float32), W)
    bias1 = jnp.tile(b1.astype(jnp.float32), W).reshape(1, W * C)
    bias2 = jnp.tile(b2.astype(jnp.float32), W).reshape(1, W * C)
    s_dn, s_up = _row_shift_mats(N, H)

    NH, WC = N * H, W * C
    x2d = x_nhwc.reshape(NH, WC).astype(jnp.float32)        # lane-dense view

    out2d = pl.pallas_call(
        _resblock_kernel,
        out_shape=jax.ShapeDtypeStruct((NH, WC), jnp.float32),
        grid_spec=pltpu.PrefetchScalarGridSpec(
            num_scalar_prefetch=0,
            # Whole (tiny) batch in one grid step; for large N*H, tile the row
            # dim here and mark it "parallel" (2 TCs on v7x), re-budgeting
            # VMEM against 64 MiB on v7x.
            grid=(1,),
            in_specs=[
                pl.BlockSpec((NH, WC), lambda i: (0, 0)),        # x
                pl.BlockSpec((NH, NH), lambda i: (0, 0)),        # S_dn
                pl.BlockSpec((NH, NH), lambda i: (0, 0)),        # S_up
                pl.BlockSpec((3, WC, WC), lambda i: (0, 0, 0)),  # B1
                pl.BlockSpec((1, WC), lambda i: (0, 0)),         # bias1
                pl.BlockSpec((3, WC, WC), lambda i: (0, 0, 0)),  # B2
                pl.BlockSpec((1, WC), lambda i: (0, 0)),         # bias2
            ],
            out_specs=pl.BlockSpec((NH, WC), lambda i: (0, 0)),
        ),
        compiler_params=pltpu.CompilerParams(
            dimension_semantics=("arbitrary",)),
    )(x2d, s_dn, s_up, B1, bias1, B2, bias2)

    return out2d.reshape(N, H, W, C)


def init_params(key, C):
    """Deterministic synthetic parameters (shapes from the module __init__)."""
    ks = jax.random.split(key, 7)
    eye = jnp.eye(C, dtype=jnp.float32)
    # CompactorLayer = 1x1 conv, identity-initialized (ResRep), stored (Cin, Cout).
    w_in = eye + 0.01 * jax.random.normal(ks[0], (C, C), jnp.float32)
    w_mid = eye + 0.01 * jax.random.normal(ks[1], (C, C), jnp.float32)
    w_out = eye + 0.01 * jax.random.normal(ks[2], (C, C), jnp.float32)
    # get_conv -> nn.Conv2d(C, C, 3, padding=1); stored here in HWIO layout.
    c1w = 0.1 * jax.random.normal(ks[3], (3, 3, C, C), jnp.float32)
    c1b = 0.1 * jax.random.normal(ks[4], (C,), jnp.float32)
    c2w = 0.1 * jax.random.normal(ks[5], (3, 3, C, C), jnp.float32)
    c2b = 0.1 * jax.random.normal(ks[6], (C,), jnp.float32)
    return (w_in, c1w, c1b, w_mid, c2w, c2b, w_out)


def reference(x, params):
    """Plain-JAX reference of the PyTorch forward (NHWC, unfused)."""
    w_in, c1w, c1b, w_mid, c2w, c2b, w_out = params
    hi = jax.lax.Precision.HIGHEST

    def cmix(h, w):
        return jnp.einsum('nhwc,cd->nhwd', h, w, precision=hi)

    def conv3(h, w, b):
        y = jax.lax.conv_general_dilated(
            h, w, (1, 1), 'SAME',
            dimension_numbers=('NHWC', 'HWIO', 'NHWC'), precision=hi)
        return y + b

    h = cmix(x, w_in)
    h = cmix(conv3(h, c1w, c1b), w_mid)
    h = jax.nn.relu(h)
    h = cmix(conv3(h, c2w, c2b), w_out)
    h = jax.nn.relu(h)
    return jax.nn.relu(h + x)


if __name__ == "__main__":
    key = jax.random.PRNGKey(0)
    kx, kp = jax.random.split(key)

    N, C, H, W = 2, 8, 16, 16                        # n_chn = 8 -> W*C = 128
    x_nchw = jax.random.normal(kx, (N, C, H, W), jnp.float32)   # PyTorch layout
    x_nhwc = jnp.transpose(x_nchw, (0, 2, 3, 1))                 # kernel layout

    params = init_params(kp, C)

    out = resblock64_with_mask(x_nhwc, params)
    out = jax.block_until_ready(out)

    ref = reference(x_nhwc, params)
    assert out.shape == (N, H, W, C)
    np.testing.assert_allclose(np.asarray(out), np.asarray(ref),
                               atol=2e-2, rtol=2e-2)
    print("KERNEL_OK")
</pallas_src>

<mosaic_0001>
module attributes {stable_mosaic.version = 11 : i64} {
  func.func @_resblock_kernel(%arg0: i32, %arg1: memref<32x128xf32, #tpu.memory_space<vmem>>, %arg2: memref<32x32xf32, #tpu.memory_space<vmem>>, %arg3: memref<32x32xf32, #tpu.memory_space<vmem>>, %arg4: memref<3x128x128xf32, #tpu.memory_space<vmem>>, %arg5: memref<1x128xf32, #tpu.memory_space<vmem>>, %arg6: memref<3x128x128xf32, #tpu.memory_space<vmem>>, %arg7: memref<1x128xf32, #tpu.memory_space<vmem>>, %arg8: memref<32x128xf32, #tpu.memory_space<vmem>>) attributes {dimension_semantics = [#tpu.dimension_semantics<arbitrary>], iteration_bounds = array<i64: 1>, scalar_prefetch = 0 : i64, scratch_operands = 0 : i64, tpu.core_type = #tpu.core_type<tc>, window_params = [{pipeline_mode = #tpu.pipeline_mode<synchronous>, transform_indices = @transform_0, window_bounds = array<i64: 32, 128>}, {pipeline_mode = #tpu.pipeline_mode<synchronous>, transform_indices = @transform_1, window_bounds = array<i64: 32, 32>}, {pipeline_mode = #tpu.pipeline_mode<synchronous>, transform_indices = @transform_2, window_bounds = array<i64: 32, 32>}, {pipeline_mode = #tpu.pipeline_mode<synchronous>, transform_indices = @transform_3, window_bounds = array<i64: 3, 128, 128>}, {pipeline_mode = #tpu.pipeline_mode<synchronous>, transform_indices = @transform_4, window_bounds = array<i64: 1, 128>}, {pipeline_mode = #tpu.pipeline_mode<synchronous>, transform_indices = @transform_5, window_bounds = array<i64: 3, 128, 128>}, {pipeline_mode = #tpu.pipeline_mode<synchronous>, transform_indices = @transform_6, window_bounds = array<i64: 1, 128>}, {pipeline_mode = #tpu.pipeline_mode<synchronous>, transform_indices = @transform_7, window_bounds = array<i64: 32, 128>}]} {
    %c0 = arith.constant 0 : index
    %c0_0 = arith.constant 0 : index
    %0 = vector.load %arg1[%c0, %c0_0] : memref<32x128xf32, #tpu.memory_space<vmem>>, vector<32x128xf32>
    %c0_1 = arith.constant 0 : index
    %c0_2 = arith.constant 0 : index
    %1 = vector.load %arg2[%c0_1, %c0_2] : memref<32x32xf32, #tpu.memory_space<vmem>>, vector<32x32xf32>
    %c0_3 = arith.constant 0 : index
    %c0_4 = arith.constant 0 : index
    %2 = vector.load %arg3[%c0_3, %c0_4] : memref<32x32xf32, #tpu.memory_space<vmem>>, vector<32x32xf32>
    %cst = arith.constant dense<0.000000e+00> : vector<32x128xf32>
    %3 = tpu.matmul %1, %0, %cst {dimension_numbers = #tpu.dot_dimension_numbers<[1], [0], [0], [1], [0, 0, 1, 1], [], []>} : vector<32x32xf32>, vector<32x128xf32>, vector<32x128xf32> -> vector<32x128xf32>
    %cst_5 = arith.constant dense<0.000000e+00> : vector<32x128xf32>
    %4 = tpu.matmul %2, %0, %cst_5 {dimension_numbers = #tpu.dot_dimension_numbers<[1], [0], [0], [1], [0, 0, 1, 1], [], []>} : vector<32x32xf32>, vector<32x128xf32>, vector<32x128xf32> -> vector<32x128xf32>
    %c0_6 = arith.constant 0 : index
    %c0_7 = arith.constant 0 : index
    %5 = vector.load %arg5[%c0_6, %c0_7] : memref<1x128xf32, #tpu.memory_space<vmem>>, vector<1x128xf32>
    %c0_8 = arith.constant 0 : index
    %c0_9 = arith.constant 0 : index
    %c0_10 = arith.constant 0 : index
    %6 = vector.load %arg4[%c0_8, %c0_9, %c0_10] : memref<3x128x128xf32, #tpu.memory_space<vmem>>, vector<1x128x128xf32>
    %7 = vector.shape_cast %6 : vector<1x128x128xf32> to vector<128x128xf32>
    %cst_11 = arith.constant dense<0.000000e+00> : vector<32x128xf32>
    %8 = tpu.matmul %3, %7, %cst_11 {dimension_numbers = #tpu.dot_dimension_numbers<[1], [0], [0], [1], [0, 0, 1, 1], [], []>} : vector<32x128xf32>, vector<128x128xf32>, vector<32x128xf32> -> vector<32x128xf32>
    %9 = vector.broadcast %5 : vector<1x128xf32> to vector<32x128xf32>
    %10 = arith.addf %9, %8 : vector<32x128xf32>
    %c1 = arith.constant 1 : index
    %c0_12 = arith.constant 0 : index
    %c0_13 = arith.constant 0 : index
    %11 = vector.load %arg4[%c1, %c0_12, %c0_13] : memref<3x128x128xf32, #tpu.memory_space<vmem>>, vector<1x128x128xf32>
    %12 = vector.shape_cast %11 : vector<1x128x128xf32> to vector<128x128xf32>
    %cst_14 = arith.constant dense<0.000000e+00> : vector<32x128xf32>
    %13 = tpu.matmul %0, %12, %cst_14 {dimension_numbers = #tpu.dot_dimension_numbers<[1], [0], [0], [1], [0, 0, 1, 1], [], []>} : vector<32x128xf32>, vector<128x128xf32>, vector<32x128xf32> -> vector<32x128xf32>
    %14 = arith.addf %10, %13 : vector<32x128xf32>
    %c2 = arith.constant 2 : index
    %c0_15 = arith.constant 0 : index
    %c0_16 = arith.constant 0 : index
    %15 = vector.load %arg4[%c2, %c0_15, %c0_16] : memref<3x128x128xf32, #tpu.memory_space<vmem>>, vector<1x128x128xf32>
    %16 = vector.shape_cast %15 : vector<1x128x128xf32> to vector<128x128xf32>
    %cst_17 = arith.constant dense<0.000000e+00> : vector<32x128xf32>
    %17 = tpu.matmul %4, %16, %cst_17 {dimension_numbers = #tpu.dot_dimension_numbers<[1], [0], [0], [1], [0, 0, 1, 1], [], []>} : vector<32x128xf32>, vector<128x128xf32>, vector<32x128xf32> -> vector<32x128xf32>
    %18 = arith.addf %14, %17 : vector<32x128xf32>
    %cst_18 = arith.constant 0.000000e+00 : f32
    %19 = vector.broadcast %cst_18 : f32 to vector<32x128xf32>
    %20 = arith.maximumf %18, %19 : vector<32x128xf32>
    %cst_19 = arith.constant dense<0.000000e+00> : vector<32x128xf32>
    %21 = tpu.matmul %1, %20, %cst_19 {dimension_numbers = #tpu.dot_dimension_numbers<[1], [0], [0], [1], [0, 0, 1, 1], [], []>} : vector<32x32xf32>, vector<32x128xf32>, vector<32x128xf32> -> vector<32x128xf32>
    %cst_20 = arith.constant dense<0.000000e+00> : vector<32x128xf32>
    %22 = tpu.matmul %2, %20, %cst_20 {dimension_numbers = #tpu.dot_dimension_numbers<[1], [0], [0], [1], [0, 0, 1, 1], [], []>} : vector<32x32xf32>, vector<32x128xf32>, vector<32x128xf32> -> vector<32x128xf32>
    %c0_21 = arith.constant 0 : index
    %c0_22 = arith.constant 0 : index
    %23 = vector.load %arg7[%c0_21, %c0_22] : memref<1x128xf32, #tpu.memory_space<vmem>>, vector<1x128xf32>
    %c0_23 = arith.constant 0 : index
    %c0_24 = arith.constant 0 : index
    %c0_25 = arith.constant 0 : index
    %24 = vector.load %arg6[%c0_23, %c0_24, %c0_25] : memref<3x128x128xf32, #tpu.memory_space<vmem>>, vector<1x128x128xf32>
    %25 = vector.shape_cast %24 : vector<1x128x128xf32> to vector<128x128xf32>
    %cst_26 = arith.constant dense<0.000000e+00> : vector<32x128xf32>
    %26 = tpu.matmul %21, %25, %cst_26 {dimension_numbers = #tpu.dot_dimension_numbers<[1], [0], [0], [1], [0, 0, 1, 1], [], []>} : vector<32x128xf32>, vector<128x128xf32>, vector<32x128xf32> -> vector<32x128xf32>
    %27 = vector.broadcast %23 : vector<1x128xf32> to vector<32x128xf32>
    %28 = arith.addf %27, %26 : vector<32x128xf32>
    %c1_27 = arith.constant 1 : index
    %c0_28 = arith.constant 0 : index
    %c0_29 = arith.constant 0 : index
    %29 = vector.load %arg6[%c1_27, %c0_28, %c0_29] : memref<3x128x128xf32, #tpu.memory_space<vmem>>, vector<1x128x128xf32>
    %30 = vector.shape_cast %29 : vector<1x128x128xf32> to vector<128x128xf32>
    %cst_30 = arith.constant dense<0.000000e+00> : vector<32x128xf32>
    %31 = tpu.matmul %20, %30, %cst_30 {dimension_numbers = #tpu.dot_dimension_numbers<[1], [0], [0], [1], [0, 0, 1, 1], [], []>} : vector<32x128xf32>, vector<128x128xf32>, vector<32x128xf32> -> vector<32x128xf32>
    %32 = arith.addf %28, %31 : vector<32x128xf32>
    %c2_31 = arith.constant 2 : index
    %c0_32 = arith.constant 0 : index
    %c0_33 = arith.constant 0 : index
    %33 = vector.load %arg6[%c2_31, %c0_32, %c0_33] : memref<3x128x128xf32, #tpu.memory_space<vmem>>, vector<1x128x128xf32>
    %34 = vector.shape_cast %33 : vector<1x128x128xf32> to vector<128x128xf32>
    %cst_34 = arith.constant dense<0.000000e+00> : vector<32x128xf32>
    %35 = tpu.matmul %22, %34, %cst_34 {dimension_numbers = #tpu.dot_dimension_numbers<[1], [0], [0], [1], [0, 0, 1, 1], [], []>} : vector<32x128xf32>, vector<128x128xf32>, vector<32x128xf32> -> vector<32x128xf32>
    %36 = arith.addf %32, %35 : vector<32x128xf32>
    %cst_35 = arith.constant 0.000000e+00 : f32
    %37 = vector.broadcast %cst_35 : f32 to vector<32x128xf32>
    %38 = arith.maximumf %36, %37 : vector<32x128xf32>
    %39 = arith.addf %38, %0 : vector<32x128xf32>
    %cst_36 = arith.constant 0.000000e+00 : f32
    %40 = vector.broadcast %cst_36 : f32 to vector<32x128xf32>
    %41 = arith.maximumf %39, %40 : vector<32x128xf32>
    %c0_37 = arith.constant 0 : index
    %c0_38 = arith.constant 0 : index
    %42 = vector.load %arg8[%c0_37, %c0_38] : memref<32x128xf32, #tpu.memory_space<vmem>>, vector<32x128xf32>
    tpu.vector_store %arg8[%c0_37, %c0_38], %41 {strides = array<i32>} : memref<32x128xf32, #tpu.memory_space<vmem>>, vector<32x128xf32>,
    return
  }
  func.func @transform_0(%arg0: i32) -> (i32, i32) {
    %c0_i32 = arith.constant 0 : i32
    %c0_i32_0 = arith.constant 0 : i32
    %c0_i32_1 = arith.constant 0 : i32
    return %c0_i32, %c0_i32_0 : i32, i32
  }
  func.func @transform_1(%arg0: i32) -> (i32, i32) {
    %c0_i32 = arith.constant 0 : i32
    %c0_i32_0 = arith.constant 0 : i32
    %c0_i32_1 = arith.constant 0 : i32
    return %c0_i32, %c0_i32_0 : i32, i32
  }
  func.func @transform_2(%arg0: i32) -> (i32, i32) {
    %c0_i32 = arith.constant 0 : i32
    %c0_i32_0 = arith.constant 0 : i32
    %c0_i32_1 = arith.constant 0 : i32
    return %c0_i32, %c0_i32_0 : i32, i32
  }
  func.func @transform_3(%arg0: i32) -> (i32, i32, i32) {
    %c0_i32 = arith.constant 0 : i32
    %c0_i32_0 = arith.constant 0 : i32
    %c0_i32_1 = arith.constant 0 : i32
    %c0_i32_2 = arith.constant 0 : i32
    return %c0_i32, %c0_i32_0, %c0_i32_1 : i32, i32, i32
  }
  func.func @transform_4(%arg0: i32) -> (i32, i32) {
    %c0_i32 = arith.constant 0 : i32
    %c0_i32_0 = arith.constant 0 : i32
    %c0_i32_1 = arith.constant 0 : i32
    return %c0_i32, %c0_i32_0 : i32, i32
  }
  func.func @transform_5(%arg0: i32) -> (i32, i32, i32) {
    %c0_i32 = arith.constant 0 : i32
    %c0_i32_0 = arith.constant 0 : i32
    %c0_i32_1 = arith.constant 0 : i32
    %c0_i32_2 = arith.constant 0 : i32
    return %c0_i32, %c0_i32_0, %c0_i32_1 : i32, i32, i32
  }
  func.func @transform_6(%arg0: i32) -> (i32, i32) {
    %c0_i32 = arith.constant 0 : i32
    %c0_i32_0 = arith.constant 0 : i32
    %c0_i32_1 = arith.constant 0 : i32
    return %c0_i32, %c0_i32_0 : i32, i32
  }
  func.func @transform_7(%arg0: i32) -> (i32, i32) {
    %c0_i32 = arith.constant 0 : i32
    %c0_i32_0 = arith.constant 0 : i32
    %c0_i32_1 = arith.constant 0 : i32
    return %c0_i32, %c0_i32_0 : i32, i32
  }
}

</mosaic_0001>

<bundles_post_ra>
// kernel: tpu_custom_call.1
= control target key start
LH: loop header
LB: loop body
LE: loop exit
PB: predicated region body
PF: predicated region fallthrough
CT: control target
= control target key end

     0   :  { %12 = vsyncpa [#allocation3], 0  ;;  %s1919_s0 = inlined_call_operand.hbm [shape: f32[32,128], index: 0, kind: input, shape index: {}]   ;;  %s1920_s1 = inlined_call_operand.hbm [shape: f32[32,32], index: 1, kind: input, shape index: {}]   ;;  %s1921_s2 = inlined_call_operand.hbm [shape: f32[32,32], index: 2, kind: input, shape index: {}]   ;;  %s1922_s3 = inlined_call_operand.hbm [shape: f32[3,128,128], index: 3, kind: input, shape index: {}]   ;;  %s1923_s4 = inlined_call_operand.vmem [shape: f32[1,128], index: 4, kind: input, shape index: {}]   ;;  %s1924_s5 = inlined_call_operand.hbm [shape: f32[3,128,128], index: 5, kind: input, shape index: {}]   ;;  %s1925_s6 = inlined_call_operand.vmem [shape: f32[1,128], index: 6, kind: input, shape index: {}]   ;;  %s1926_s7 = inlined_call_operand.hbm [shape: f32[32,128], index: 7, kind: output, shape index: {}]  }
   0x1   :  { %13 = vsyncpa [#allocation6], 0 }
   0x2   :  { %14 = vsyncpa [#allocation9], 0 }
   0x3   :  { %15 = vsyncpa [#allocation4], 0  ;;  %s1749_s24 = smov [#allocation5]   ;;  %s1750_s26 = smov [#allocation8]  }
   0x4   :  { %s33_s25 = sshll.u32 %s1749_s24, 4  ;;  %s57_s27 = sshll.u32 %s1750_s26, 4  ;;  %s34_s25 = int_to_ptr.vmem [resolvable:$true] %s33_s25  ;;  %s58_s27 = int_to_ptr.vmem [resolvable:$true] %s57_s27 }
   0x5   :  { %s1629_s28 = scalar_lea.vmem %s34_s25, 512  ;;  %p1634_p1 = scmp.lt.s32.totalorder %s34_s25, %s34_s25 }
   0x6   :  { %p1630_p0 = scmp.ne.s32.totalorder %s34_s25, %s1629_s28  ;;  %p1635_p2 = scmp.lt.s32.totalorder %s1629_s28, %s1629_s28 }
   0x8   :  { %p1636_p3 = por %p1635_p2, %p1634_p1 }
   0xa   :  { %p1637_p4 = pnand %p1636_p3, %p1630_p0 }
   0xc   :  { %1640 = shalt.err (!%p1637_p4)
}
   0xd   :  { %s1751_s29 = smov 128   ;;  %s1752_s30 = smov 8  }
   0xe   :  { %39 = dma.hbm_to_vmem [thread:$0]  %s1920_s1, 512, %s34_s25, [#allocation6], %s1751_s29, %s1751_s29, %s1752_s30  }
   0xf   :  { %s1649_s10 = scalar_lea.vmem %s58_s27, 6144  ;;  %p1654_p6 = scmp.lt.s32.totalorder %s58_s27, %s58_s27 }
  0x10   :  { %p1650_p5 = scmp.ne.s32.totalorder %s58_s27, %s1649_s10  ;;  %p1655_p7 = scmp.lt.s32.totalorder %s1649_s10, %s1649_s10 }
  0x12   :  { %p1656_p8 = por %p1655_p7, %p1654_p6 }
  0x14   :  { %p1657_p9 = pnand %p1656_p8, %p1650_p5 }
  0x16   :  { %1660 = shalt.err (!%p1657_p9)
}
  0x17   :  { %63 = dma.hbm_to_vmem [thread:$0]  %s1922_s3, 6144, %s58_s27, [#allocation9], %s1751_s29, %s1751_s29, %s1752_s30  }
  0x18   :  { %s1753_s13 = smov [#allocation2]   ;;  %s1754_s15 = smov [#allocation7]  }
  0x19   :  { %s21_s14 = sshll.u32 %s1753_s13, 4  ;;  %s45_s16 = sshll.u32 %s1754_s15, 4  ;;  %s22_s14 = int_to_ptr.vmem [resolvable:$true] %s21_s14  ;;  %s46_s16 = int_to_ptr.vmem [resolvable:$true] %s45_s16 }
  0x1a   :  { %s1669_s1 = scalar_lea.vmem %s22_s14, 512  ;;  %p1674_p11 = scmp.lt.s32.totalorder %s22_s14, %s22_s14 }
  0x1b   :  { %p1670_p10 = scmp.ne.s32.totalorder %s22_s14, %s1669_s1  ;;  %p1675_p12 = scmp.lt.s32.totalorder %s1669_s1, %s1669_s1 }
  0x1d   :  { %p1676_p13 = por %p1675_p12, %p1674_p11 }
  0x1f   :  { %p1677_p0 = pnand %p1676_p13, %p1670_p10 }
  0x21   :  { %1680 = shalt.err (!%p1677_p0)
}
  0x22   :  { %27 = dma.hbm_to_vmem [thread:$0]  %s1919_s0, 512, %s22_s14, [#allocation3], %s1751_s29, %s1751_s29, %s1752_s30  }
  0x23   :  { %s1689_s3 = scalar_lea.vmem %s46_s16, 512  ;;  %p1694_p2 = scmp.lt.s32.totalorder %s46_s16, %s46_s16 }
  0x24   :  { %p1690_p1 = scmp.ne.s32.totalorder %s46_s16, %s1689_s3  ;;  %p1695_p3 = scmp.lt.s32.totalorder %s1689_s3, %s1689_s3 }
  0x26   :  { %p1696_p4 = por %p1695_p3, %p1694_p2 }
  0x28   :  { %p1697_p5 = pnand %p1696_p4, %p1690_p1 }
  0x2a   :  { %1700 = shalt.err (!%p1697_p5)
}
  0x2b   :  { %51 = dma.hbm_to_vmem [thread:$0]  %s1921_s2, 512, %s46_s16, [#allocation6], %s1751_s29, %s1751_s29, %s1752_s30  }
  0x2c   :  { %s1755_s21 = smov [#allocation10]  }
  0x2d   :  { %s71_s22 = sshll.u32 %s1755_s21, 4  ;;  %s72_s22 = int_to_ptr.vmem [resolvable:$true] %s71_s22 }
  0x2e   :  { %s1709_s23 = scalar_lea.vmem %s72_s22, 6144  ;;  %p1714_p7 = scmp.lt.s32.totalorder %s72_s22, %s72_s22 }
  0x2f   :  { %p1710_p6 = scmp.ne.s32.totalorder %s72_s22, %s1709_s23  ;;  %p1715_p8 = scmp.lt.s32.totalorder %s1709_s23, %s1709_s23 }
  0x31   :  { %p1716_p9 = por %p1715_p8, %p1714_p7 }
  0x33   :  { %p1717_p10 = pnand %p1716_p9, %p1710_p6 }
  0x35   :  { %1720 = shalt.err (!%p1717_p10)
}
  0x36   :  { %77 = dma.hbm_to_vmem [thread:$0]  %s1924_s5, 6144, %s72_s22, [#allocation9], %s1751_s29, %s1751_s29, %s1752_s30  }
  0x37   :  { %1741 = dma.done.wait [#allocation3], 512  }
  0x38   :  { %1742 = vsyncadd [#allocation3], 4294966784 }
  0x39   :  { %1743 = dma.done.wait [#allocation6], 1024  }
  0x3a   :  { %1744 = vsyncadd [#allocation6], 4294966272 }
  0x3b   :  { %1745 = dma.done.wait [#allocation9], 12288  }
  0x3c   :  { %1746 = vsyncadd [#allocation9], 4294955008  ;;  %vm107_vm0 = vcmask 261120   ;;  %v1827_v0 = vld [vmem:[#allocation2 + $0x18] sm:$0xff]  ;;  %v1829_v1 = vld [vmem:[#allocation2 + $0x10] sm:$0xff] }
  0x3d   :  { %1329 = vmatprep.subr.mxu0 %v1827_v0  ;;  %v1832_v2 = vld [vmem:[#allocation5] sm:$0xff]  ;;  %v1835_v3 = vld [vmem:[#allocation2 + $0x8] sm:$0xff]  ;;  %v430_v5 = vld [vmem:[#allocation8 + $0xf8] sm:$0xff] }
  0x3e   :  { %1330 = vmatpush3.msra.mxu0 %v1827_v0  ;;  %v1837_v4 = vld [vmem:[#allocation2] sm:$0xff]  ;;  %1337 = vmatprep.mubr.msk.f32.mxu0 %vm107_vm0, %v1832_v2  ;;  %v429_v6 = vld [vmem:[#allocation8 + $0xf0] sm:$0xff]  ;;  %v1846_v7 = vld [vmem:[#allocation5 + $0x8] sm:$0xff] }
  0x3f   :  { %1331 = vmatprep.subr.mxu0 %v1829_v1  ;;  %1427 = vmatprep.mubr.f32.mxu1 %v1837_v4  ;;  %v1849_v8 = vld [vmem:[#allocation5 + $0x10] sm:$0xff]  ;;  %v428_v9 = vld [vmem:[#allocation8 + $0xe8] sm:$0xff]  ;;  %v1857_v10 = vld [vmem:[#allocation5 + $0x18] sm:$0xff] }
  0x40   :  { %1332 = vmatpush3.msra.mxu0 %v1829_v1  ;;  %1395 = vmatprep.subr.mxu1 %v430_v5  ;;  %v1861_v11 = vld [vmem:[#allocation7] sm:$0xff]  ;;  %v1870_v13 = vld [vmem:[#allocation7 + $0x8] sm:$0xff]  ;;  %v318_v14 = vld [vmem:[#allocation8 + $0x78] sm:$0xff] }
  0x41   :  { %1333 = vmatprep.subr.mxu0 %v1835_v3  ;;  %1396 = vmatpush3.msra.mxu1 %v430_v5  ;;  %v427_v12 = vld [vmem:[#allocation8 + $0xe0] sm:$0xff]  ;;  %v1873_v15 = vld [vmem:[#allocation7 + $0x10] sm:$0xff]  ;;  %v426_v17 = vld [vmem:[#allocation8 + $0xd8] sm:$0xff] }
  0x42   :  { %1334 = vmatpush3.msra.mxu0 %v1835_v3  ;;  %1397 = vmatprep.subr.mxu1 %v429_v6  ;;  %v317_v16 = vld [vmem:[#allocation8 + $0x70] sm:$0xff]  ;;  %v1880_v18 = vld [vmem:[#allocation7 + $0x18] sm:$0xff]  ;;  %v316_v19 = vld [vmem:[#allocation8 + $0x68] sm:$0xff] }
  0x43   :  { %1335 = vmatprep.subr.mxu0 %v1837_v4  ;;  %1398 = vmatpush3.msra.mxu1 %v429_v6  ;;  %v425_v20 = vld [vmem:[#allocation8 + $0xd0] sm:$0xff]  ;;  %v315_v21 = vld [vmem:[#allocation8 + $0x60] sm:$0xff]  ;;  %v424_v22 = vld [vmem:[#allocation8 + $0xc8] sm:$0xff] }
  0x44   :  { %1336 = vmatpush3.msra.mxu0 %v1837_v4  ;;  %1399 = vmatprep.subr.mxu1 %v428_v9  ;;  %v314_v23 = vld [vmem:[#allocation8 + $0x58] sm:$0xff]  ;;  %v423_v24 = vld [vmem:[#allocation8 + $0xc0] sm:$0xff]  ;;  %v313_v25 = vld [vmem:[#allocation8 + $0x50] sm:$0xff] }
  0x45   :  { %1338 = vmatmul.mubr.msk.f32.vlgmr.msra.gmra.mxu0 %vm107_vm0, %v1846_v7  ;;  %1343 = vmatprep.subr.mxu0 %v1827_v0  ;;  %v422_v26 = vld [vmem:[#allocation8 + $0xb8] sm:$0xff]  ;;  %v312_v27 = vld [vmem:[#allocation8 + $0x48] sm:$0xff]  ;;  %v421_v28 = vld [vmem:[#allocation8 + $0xb0] sm:$0xff] }
  0x46   :  { %1340 = vmatprep.mubr.msk.f32.mxu0 %vm107_vm0, %v1849_v8  ;;  %1344 = vmatpush3.msra.mxu0 %v1827_v0  ;;  %v311_v29 = vld [vmem:[#allocation8 + $0x40] sm:$0xff]  ;;  %v420_v30 = vld [vmem:[#allocation8 + $0xa8] sm:$0xff]  ;;  %v310_v31 = vld [vmem:[#allocation8 + $0x38] sm:$0xff] }
  0x47   :  { %1345 = vmatprep.subr.mxu0 %v1829_v1  ;;  %1400 = vmatpush3.msra.mxu1 %v428_v9  ;;  %v419_v32 = vld [vmem:[#allocation8 + $0xa0] sm:$0xff]  ;;  %v309_v33 = vld [vmem:[#allocation8 + $0x30] sm:$0xff]  ;;  %v418_v34 = vld [vmem:[#allocation8 + $0x98] sm:$0xff] }
  0x48   :  { %1346 = vmatpush3.msra.mxu0 %v1829_v1  ;;  %1401 = vmatprep.subr.mxu1 %v427_v12  ;;  %v308_v35 = vld [vmem:[#allocation8 + $0x28] sm:$0xff]  ;;  %v307_v36 = vld [vmem:[#allocation8 + $0x20] sm:$0xff]  ;;  %v306_v37 = vld [vmem:[#allocation8 + $0x18] sm:$0xff] }
  0x49   :  { %1341 = vmatmul.mubr.msk.f32.gmra.mxu0 %vm107_vm0, %v1857_v10  ;;  %1347 = vmatprep.subr.mxu0 %v1835_v3  ;;  %v305_v38 = vld [vmem:[#allocation8 + $0x10] sm:$0xff]  ;;  %v304_v39 = vld [vmem:[#allocation8 + $0x8] sm:$0xff]  ;;  %v303_v41 = vld [vmem:[#allocation8] sm:$0xff] }
  0x4a   :  { %1348 = vmatpush3.msra.mxu0 %v1835_v3  ;;  %1351 = vmatprep.mubr.msk.f32.mxu0 %vm107_vm0, %v1861_v11  ;;  %v417_v40 = vld [vmem:[#allocation8 + $0x90] sm:$0xff]  ;;  %v416_v42 = vld [vmem:[#allocation8 + $0x88] sm:$0xff]  ;;  %v536_v43 = vld [vmem:[#allocation8 + $0x178] sm:$0xff] }
  0x4b   :  { %1349 = vmatprep.subr.mxu0 %v1837_v4  ;;  %1402 = vmatpush3.msra.mxu1 %v427_v12  ;;  %v415_v44 = vld [vmem:[#allocation8 + $0x80] sm:$0xff]  ;;  %v535_v47 = vld [vmem:[#allocation8 + $0x170] sm:$0xff]  ;;  %v534_v49 = vld [vmem:[#allocation8 + $0x168] sm:$0xff] }
  0x4c   :  { %1350 = vmatpush3.msra.mxu0 %v1837_v4  ;;  %1403 = vmatprep.subr.mxu1 %v426_v17  ;;  %v533_v51 = vld [vmem:[#allocation8 + $0x160] sm:$0xff]  ;;  %v532_v53 = vld [vmem:[#allocation8 + $0x158] sm:$0xff]  ;;  %v531_v55 = vld [vmem:[#allocation8 + $0x150] sm:$0xff] }
  0x4d   :  { %1352 = vmatmul.mubr.msk.f32.vlgmr.msra.gmra.mxu0 %vm107_vm0, %v1870_v13  ;;  %1357 = vmatprep.subr.mxu0 %v318_v14  ;;  %v530_v56 = vld [vmem:[#allocation8 + $0x148] sm:$0xff]  ;;  %v529_v57 = vld [vmem:[#allocation8 + $0x140] sm:$0xff]  ;;  %v528_v58 = vld [vmem:[#allocation8 + $0x138] sm:$0xff] }
  0x4e   :  { %1354 = vmatprep.mubr.msk.f32.mxu0 %vm107_vm0, %v1873_v15  ;;  %1358 = vmatpush3.msra.mxu0 %v318_v14  ;;  %v527_v59 = vld [vmem:[#allocation8 + $0x130] sm:$0xff]  ;;  %v526_v60 = vld [vmem:[#allocation8 + $0x128] sm:$0xff]  ;;  %v525_v61 = vld [vmem:[#allocation8 + $0x120] sm:$0xff] }
  0x4f   :  { %1359 = vmatprep.subr.mxu0 %v317_v16  ;;  %1404 = vmatpush3.msra.mxu1 %v426_v17  ;;  %v524_v62 = vld [vmem:[#allocation8 + $0x118] sm:$0xff]  ;;  %v523_v63 = vld [vmem:[#allocation8 + $0x110] sm:$0xff]  ;;  %v521_v6 = vld [vmem:[#allocation8 + $0x100] sm:$0xff] }
  0x50   :  { %1360 = vmatpush3.msra.mxu0 %v317_v16  ;;  %1405 = vmatprep.subr.mxu1 %v425_v20  ;;  %v928_v12 = vld [vmem:[#allocation10 + $0xf8] sm:$0xff]  ;;  %v927_v14 = vld [vmem:[#allocation10 + $0xf0] sm:$0xff]  ;;  %v926_v16 = vld [vmem:[#allocation10 + $0xe8] sm:$0xff] }
  0x51   :  { %1355 = vmatmul.mubr.msk.f32.gmra.mxu0 %vm107_vm0, %v1880_v18  ;;  %1361 = vmatprep.subr.mxu0 %v316_v19  ;;  %v925_v17 = vld [vmem:[#allocation10 + $0xe0] sm:$0xff] }
  0x52   :  { %1362 = vmatpush3.msra.mxu0 %v316_v19  ;;  %1406 = vmatpush3.msra.mxu1 %v425_v20  ;;  %v924_v19 = vld [vmem:[#allocation10 + $0xd8] sm:$0xff]  ;;  %v923_v20 = vld [vmem:[#allocation10 + $0xd0] sm:$0xff] }
  0x53   :  { %1363 = vmatprep.subr.mxu0 %v315_v21  ;;  %1407 = vmatprep.subr.mxu1 %v424_v22 }
  0x54   :  { %1364 = vmatpush3.msra.mxu0 %v315_v21  ;;  %1408 = vmatpush3.msra.mxu1 %v424_v22  ;;  %v922_v21 = vld [vmem:[#allocation10 + $0xc8] sm:$0xff]  ;;  %v921_v22 = vld [vmem:[#allocation10 + $0xc0] sm:$0xff] }
  0x55   :  { %1365 = vmatprep.subr.mxu0 %v314_v23  ;;  %1409 = vmatprep.subr.mxu1 %v423_v24 }
  0x56   :  { %1366 = vmatpush3.msra.mxu0 %v314_v23  ;;  %1410 = vmatpush3.msra.mxu1 %v423_v24  ;;  %v920_v23 = vld [vmem:[#allocation10 + $0xb8] sm:$0xff]  ;;  %v919_v24 = vld [vmem:[#allocation10 + $0xb0] sm:$0xff] }
  0x57   :  { %1367 = vmatprep.subr.mxu0 %v313_v25  ;;  %1411 = vmatprep.subr.mxu1 %v422_v26 }
  0x58   :  { %1368 = vmatpush3.msra.mxu0 %v313_v25  ;;  %1412 = vmatpush3.msra.mxu1 %v422_v26  ;;  %v918_v25 = vld [vmem:[#allocation10 + $0xa8] sm:$0xff]  ;;  %v917_v26 = vld [vmem:[#allocation10 + $0xa0] sm:$0xff] }
  0x59   :  { %1369 = vmatprep.subr.mxu0 %v312_v27  ;;  %1413 = vmatprep.subr.mxu1 %v421_v28 }
  0x5a   :  { %1370 = vmatpush3.msra.mxu0 %v312_v27  ;;  %1414 = vmatpush3.msra.mxu1 %v421_v28  ;;  %v916_v27 = vld [vmem:[#allocation10 + $0x98] sm:$0xff]  ;;  %v915_v28 = vld [vmem:[#allocation10 + $0x90] sm:$0xff] }
  0x5b   :  { %1371 = vmatprep.subr.mxu0 %v311_v29  ;;  %1415 = vmatprep.subr.mxu1 %v420_v30 }
  0x5c   :  { %1372 = vmatpush3.msra.mxu0 %v311_v29  ;;  %1416 = vmatpush3.msra.mxu1 %v420_v30  ;;  %v914_v29 = vld [vmem:[#allocation10 + $0x88] sm:$0xff]  ;;  %v913_v30 = vld [vmem:[#allocation10 + $0x80] sm:$0xff] }
  0x5d   :  { %1373 = vmatprep.subr.mxu0 %v310_v31  ;;  %1417 = vmatprep.subr.mxu1 %v419_v32 }
  0x5e   :  { %1374 = vmatpush3.msra.mxu0 %v310_v31  ;;  %1418 = vmatpush3.msra.mxu1 %v419_v32 }
  0x5f   :  { %1375 = vmatprep.subr.mxu0 %v309_v33  ;;  %1419 = vmatprep.subr.mxu1 %v418_v34 }
  0x60   :  { %1376 = vmatpush3.msra.mxu0 %v309_v33  ;;  %1420 = vmatpush3.msra.mxu1 %v418_v34  ;;  %v1167_v34 = vld [vmem:[%s1923_s4] ss:$0 sm:$0xff] }
  0x61   :  { %1377 = vmatprep.subr.mxu0 %v308_v35  ;;  %1421 = vmatprep.subr.mxu1 %v417_v40 }
  0x62   :  { %1378 = vmatpush3.msra.mxu0 %v308_v35  ;;  %1422 = vmatpush3.msra.mxu1 %v417_v40 }
  0x63   :  { %1379 = vmatprep.subr.mxu0 %v307_v36  ;;  %1423 = vmatprep.subr.mxu1 %v416_v42 }
  0x64   :  { %1380 = vmatpush3.msra.mxu0 %v307_v36  ;;  %1424 = vmatpush3.msra.mxu1 %v416_v42 }
  0x65   :  { %1381 = vmatprep.subr.mxu0 %v306_v37  ;;  %1425 = vmatprep.subr.mxu1 %v415_v44 }
  0x66   :  { %1382 = vmatpush3.msra.mxu0 %v306_v37  ;;  %1426 = vmatpush3.msra.mxu1 %v415_v44 }
  0x67   :  { %1383 = vmatprep.subr.mxu0 %v305_v38  ;;  %1428 = vmatmul.mubr.f32.vlgmr.msra.gmra.mxu1 %v1835_v3 }
  0x68   :  { %1384 = vmatpush3.msra.mxu0 %v305_v38  ;;  %1430 = vmatprep.mubr.f32.mxu1 %v1829_v1 }
  0x69   :  { %1385 = vmatprep.subr.mxu0 %v304_v39 }
  0x6a   :  { %1386 = vmatpush3.msra.mxu0 %v304_v39 }
  0x6b   :  { %1387 = vmatprep.subr.mxu0 %v303_v41  ;;  %1431 = vmatmul.mubr.f32.gmra.mxu1 %v1827_v0 }
  0x6c   :  { %1388 = vmatpush3.msra.mxu0 %v303_v41  ;;  %1479 = vmatprep.mubr.msk.f32.mxu1 %vm107_vm0, %v1832_v2  ;;  %v522_v2 = vld [vmem:[#allocation8 + $0x108] sm:$0xff] }
  0x6d   :  { %1433 = vmatprep.subr.mxu0 %v536_v43 }
 0x105   :  { %v1339_v45 = vpop.f32.mrf.mxu0 }
 0x107   :  { %v186_v46 = vpop.f32.mrf.mxu0 }
 0x108   :  { %1389 = vmatprep.mubr.f32.mxu0 %v186_v46 }
 0x109   :  { %1390 = vmatmul.mubr.f32.vlgmr.msra.gmra.mxu0 %v1339_v45  ;;  %v1342_v48 = vpop.f32.mrf.mxu0 }
 0x10a   :  { %1434 = vmatpush3.msra.mxu0 %v536_v43 }
 0x10b   :  { %1435 = vmatprep.subr.mxu0 %v535_v47  ;;  %v196_v50 = vpop.f32.mrf.mxu0 }
 0x10c   :  { %1436 = vmatpush3.msra.mxu0 %v535_v47  ;;  %1392 = vmatprep.mubr.f32.mxu0 %v196_v50 }
 0x10d   :  { %1437 = vmatprep.subr.mxu0 %v534_v49  ;;  %1393 = vmatmul.mubr.f32.gmra.mxu0 %v1342_v48  ;;  %v1353_v52 = vpop.f32.mrf.mxu0 }
 0x10e   :  { %1438 = vmatpush3.msra.mxu0 %v534_v49 }
 0x10f   :  { %1439 = vmatprep.subr.mxu0 %v533_v51  ;;  %v283_v54 = vpop.f32.mrf.mxu0 }
 0x110   :  { %1440 = vmatpush3.msra.mxu0 %v533_v51  ;;  %1465 = vmatprep.mubr.f32.mxu0 %v283_v54 }
 0x111   :  { %1441 = vmatprep.subr.mxu0 %v532_v53  ;;  %v1356_v5 = vpop.f32.mrf.mxu0 }
 0x112   :  { %1442 = vmatpush3.msra.mxu0 %v532_v53 }
 0x113   :  { %1443 = vmatprep.subr.mxu0 %v531_v55  ;;  %v293_v9 = vpop.f32.mrf.mxu0 }
 0x114   :  { %1444 = vmatpush3.msra.mxu0 %v531_v55 }
 0x115   :  { %1445 = vmatprep.subr.mxu0 %v530_v56 }
 0x116   :  { %1446 = vmatpush3.msra.mxu0 %v530_v56 }
 0x117   :  { %1447 = vmatprep.subr.mxu0 %v529_v57 }
 0x118   :  { %1448 = vmatpush3.msra.mxu0 %v529_v57 }
 0x119   :  { %1449 = vmatprep.subr.mxu0 %v528_v58 }
 0x11a   :  { %1450 = vmatpush3.msra.mxu0 %v528_v58 }
 0x11b   :  { %1451 = vmatprep.subr.mxu0 %v527_v59 }
 0x11c   :  { %1452 = vmatpush3.msra.mxu0 %v527_v59 }
 0x11d   :  { %1453 = vmatprep.subr.mxu0 %v526_v60 }
 0x11e   :  { %1454 = vmatpush3.msra.mxu0 %v526_v60  ;;  %v816_v60 = vld [vmem:[#allocation10 + $0x78] sm:$0xff] }
 0x11f   :  { %1455 = vmatprep.subr.mxu0 %v525_v61 }
 0x120   :  { %1456 = vmatpush3.msra.mxu0 %v525_v61  ;;  %v815_v61 = vld [vmem:[#allocation10 + $0x70] sm:$0xff] }
 0x121   :  { %1457 = vmatprep.subr.mxu0 %v524_v62 }
 0x122   :  { %1458 = vmatpush3.msra.mxu0 %v524_v62  ;;  %v808_v62 = vld [vmem:[#allocation10 + $0x38] sm:$0xff] }
 0x123   :  { %1459 = vmatprep.subr.mxu0 %v523_v63 }
 0x124   :  { %1460 = vmatpush3.msra.mxu0 %v523_v63  ;;  %v807_v63 = vld [vmem:[#allocation10 + $0x30] sm:$0xff] }
 0x125   :  { %1461 = vmatprep.subr.mxu0 %v522_v2 }
 0x126   :  { %1462 = vmatpush3.msra.mxu0 %v522_v2  ;;  %v805_v2 = vld [vmem:[#allocation10 + $0x20] sm:$0xff] }
 0x127   :  { %1463 = vmatprep.subr.mxu0 %v521_v6  ;;  %v1429_v33 = vpop.f32.mrf.mxu1 }
 0x128   :  { %1464 = vmatpush3.msra.mxu0 %v521_v6  ;;  %v803_v6 = vld [vmem:[#allocation10 + $0x10] sm:$0xff] }
 0x129   :  { %1466 = vmatmul.mubr.f32.vlgmr.msra.gmra.mxu0 %v1353_v52  ;;  %1537 = vmatprep.subr.mxu0 %v928_v12  ;;  %v497_v37 = vpop.f32.mrf.mxu1 }
 0x12a   :  { %1468 = vmatprep.mubr.f32.mxu0 %v293_v9  ;;  %1538 = vmatpush3.msra.mxu0 %v928_v12  ;;  %v802_v9 = vld [vmem:[#allocation10 + $0x8] sm:$0xff]  ;;  %v801_v12 = vld [vmem:[#allocation10] sm:$0xff] }
 0x12b   :  { %1539 = vmatprep.subr.mxu0 %v927_v14  ;;  %v1432_v40 = vpop.f32.mrf.mxu1 }
 0x12c   :  { %1540 = vmatpush3.msra.mxu0 %v927_v14  ;;  %v1034_v14 = vld [vmem:[#allocation10 + $0x178] sm:$0xff] }
 0x12d   :  { %1469 = vmatmul.mubr.f32.gmra.mxu0 %v1356_v5  ;;  %1541 = vmatprep.subr.mxu0 %v926_v16  ;;  %v507_v46 = vpop.f32.mrf.mxu1  ;;  %v804_v5 = vld [vmem:[#allocation10 + $0x18] sm:$0xff] }
 0x12e   :  { %1542 = vmatpush3.msra.mxu0 %v926_v16 }
 0x12f   :  { %1543 = vmatprep.subr.mxu0 %v925_v17 }
 0x130   :  { %1544 = vmatpush3.msra.mxu0 %v925_v17 }
 0x131   :  { %1545 = vmatprep.subr.mxu0 %v924_v19 }
 0x132   :  { %1546 = vmatpush3.msra.mxu0 %v924_v19  ;;  %v1033_v19 = vld [vmem:[#allocation10 + $0x170] sm:$0xff] }
 0x133   :  { %1547 = vmatprep.subr.mxu0 %v923_v20 }
 0x134   :  { %1548 = vmatpush3.msra.mxu0 %v923_v20 }
 0x135   :  { %1549 = vmatprep.subr.mxu0 %v922_v21 }
 0x136   :  { %1550 = vmatpush3.msra.mxu0 %v922_v21  ;;  %v1032_v21 = vld [vmem:[#allocation10 + $0x168] sm:$0xff] }
 0x137   :  { %1551 = vmatprep.subr.mxu0 %v921_v22 }
 0x138   :  { %1552 = vmatpush3.msra.mxu0 %v921_v22 }
 0x139   :  { %1553 = vmatprep.subr.mxu0 %v920_v23 }
 0x13a   :  { %1554 = vmatpush3.msra.mxu0 %v920_v23  ;;  %v1031_v23 = vld [vmem:[#allocation10 + $0x160] sm:$0xff] }
 0x13b   :  { %1555 = vmatprep.subr.mxu0 %v919_v24 }
 0x13c   :  { %1556 = vmatpush3.msra.mxu0 %v919_v24 }
 0x13d   :  { %1557 = vmatprep.subr.mxu0 %v918_v25 }
 0x13e   :  { %1558 = vmatpush3.msra.mxu0 %v918_v25  ;;  %v1030_v25 = vld [vmem:[#allocation10 + $0x158] sm:$0xff] }
 0x13f   :  { %1559 = vmatprep.subr.mxu0 %v917_v26 }
 0x140   :  { %1560 = vmatpush3.msra.mxu0 %v917_v26 }
 0x141   :  { %1561 = vmatprep.subr.mxu0 %v916_v27 }
 0x142   :  { %1562 = vmatpush3.msra.mxu0 %v916_v27  ;;  %v1029_v27 = vld [vmem:[#allocation10 + $0x150] sm:$0xff] }
 0x143   :  { %1563 = vmatprep.subr.mxu0 %v915_v28 }
 0x144   :  { %1564 = vmatpush3.msra.mxu0 %v915_v28  ;;  %v1028_v28 = vld [vmem:[#allocation10 + $0x148] sm:$0xff] }
 0x145   :  { %1565 = vmatprep.subr.mxu0 %v914_v29 }
 0x146   :  { %1566 = vmatpush3.msra.mxu0 %v914_v29  ;;  %v1027_v29 = vld [vmem:[#allocation10 + $0x140] sm:$0xff] }
 0x147   :  { %1567 = vmatprep.subr.mxu0 %v913_v30 }
 0x148   :  { %1568 = vmatpush3.msra.mxu0 %v913_v30  ;;  %v1026_v30 = vld [vmem:[#allocation10 + $0x138] sm:$0xff] }
 0x1c9   :  { %v1391_v31 = vpop.f32.mrf.mxu0 }
 0x1ca   :  { %v411_v36 = vadd.f32 %v1391_v31, %v1167_v34  ;;  %v1025_v31 = vld [vmem:[#allocation10 + $0x130] sm:$0xff] }
 0x1cb   :  { %v385_v32 = vpop.f32.mrf.mxu0 }
 0x1cc   :  { %v410_v38 = vadd.f32 %v1167_v34, %v385_v32  ;;  %v517_v42 = vadd.f32 %v1429_v33, %v411_v36  ;;  %v1024_v32 = vld [vmem:[#allocation10 + $0x128] sm:$0xff]  ;;  %v1023_v33 = vld [vmem:[#allocation10 + $0x120] sm:$0xff] }
 0x1cd   :  { %v1394_v35 = vpop.f32.mrf.mxu0  ;;  %v1020_v36 = vld [vmem:[#allocation10 + $0x108] sm:$0xff] }
 0x1ce   :  { %v413_v41 = vadd.f32 %v1394_v35, %v1167_v34  ;;  %v516_v44 = vadd.f32 %v497_v37, %v410_v38  ;;  %v1021_v35 = vld [vmem:[#allocation10 + $0x110] sm:$0xff]  ;;  %v1019_v38 = vld [vmem:[#allocation10 + $0x100] sm:$0xff] }
 0x1cf   :  { %v395_v39 = vpop.f32.mrf.mxu0 }
 0x1d0   :  { %v412_v45 = vadd.f32 %v1167_v34, %v395_v39  ;;  %v519_v49 = vadd.f32 %v1432_v40, %v413_v41  ;;  %v1022_v34 = vld [vmem:[#allocation10 + $0x118] sm:$0xff] }
 0x1d2   :  { %v518_v52 = vadd.f32 %v507_v46, %v412_v45 }
 0x1e9   :  { %v1467_v43 = vpop.f32.mrf.mxu0 }
 0x1ea   :  { %v623_v47 = vadd.f32 %v1467_v43, %v517_v42  ;;  %v1176_v43 = vld [vmem:[%s1925_s6] ss:$0 sm:$0xff]  ;;  %s1756_s6 = smov [#allocation11]  }
 0x1eb   :  { %v603_v48 = vpop.f32.mrf.mxu0  ;;  %s1145_s26 = sshll.u32 %s1756_s6, 4  ;;  %s1146_s26 = int_to_ptr.vmem [resolvable:$true] %s1145_s26 }
 0x1ec   :  { %v622_v50 = vadd.f32 %v603_v48, %v516_v44  ;;  %v627_v55 = vmax.f32 %v623_v47, 0.0  ;;  %s1721_s27 = scalar_lea.vmem %s1146_s26, 512  ;;  %p1726_p12 = scmp.lt.s32.totalorder %s1146_s26, %s1146_s26 }
 0x1ed   :  { %v1470_v51 = vpop.f32.mrf.mxu0  ;;  %p1722_p11 = scmp.ne.s32.totalorder %s1146_s26, %s1721_s27  ;;  %p1727_p13 = scmp.lt.s32.totalorder %s1721_s27, %s1721_s27 }
 0x1ee   :  { %v626_v53 = vmax.f32 %v622_v50, 0.0  ;;  %v625_v54 = vadd.f32 %v1470_v51, %v519_v49 }
 0x1ef   :  { %v613_v56 = vpop.f32.mrf.mxu0  ;;  %p1728_p0 = por %p1727_p13, %p1726_p12 }
 0x1f0   :  { %v629_v57 = vmax.f32 %v625_v54, 0.0  ;;  %v624_v58 = vadd.f32 %v613_v56, %v518_v52  ;;  %1569 = vmatprep.mubr.f32.mxu0 %v626_v53 }
 0x1f1   :  { %1570 = vmatmul.mubr.f32.vlgmr.msra.gmra.mxu0 %v627_v55  ;;  %p1729_p1 = pnand %p1728_p0, %p1722_p11 }
 0x1f2   :  { %v628_v59 = vmax.f32 %v624_v58, 0.0  ;;  %1471 = vmatprep.subr.mxu1 %v629_v57 }
 0x1f3   :  { %1472 = vmatpush3.msra.mxu1 %v629_v57 }
 0x1f4   :  { %1473 = vmatprep.subr.mxu1 %v628_v59  ;;  %1572 = vmatprep.mubr.f32.mxu0 %v628_v59 }
 0x1f5   :  { %1474 = vmatpush3.msra.mxu1 %v628_v59  ;;  %1573 = vmatmul.mubr.f32.gmra.mxu0 %v629_v57 }
 0x1f6   :  { %1475 = vmatprep.subr.mxu1 %v627_v55 }
 0x1f7   :  { %1476 = vmatpush3.msra.mxu1 %v627_v55 }
 0x1f8   :  { %1477 = vmatprep.subr.mxu1 %v626_v53 }
 0x1f9   :  { %1478 = vmatpush3.msra.mxu1 %v626_v53 }
 0x1fa   :  { %1480 = vmatmul.mubr.msk.f32.vlgmr.msra.gmra.mxu1 %vm107_vm0, %v1846_v7  ;;  %1485 = vmatprep.subr.mxu1 %v629_v57  ;;  %v814_v7 = vld [vmem:[#allocation10 + $0x68] sm:$0xff] }
 0x1fb   :  { %1486 = vmatpush3.msra.mxu1 %v629_v57  ;;  %1482 = vmatprep.mubr.msk.f32.mxu1 %vm107_vm0, %v1849_v8  ;;  %v813_v8 = vld [vmem:[#allocation10 + $0x60] sm:$0xff] }
 0x1fc   :  { %1487 = vmatprep.subr.mxu1 %v628_v59 }
 0x1fd   :  { %1488 = vmatpush3.msra.mxu1 %v628_v59 }
 0x1fe   :  { %1483 = vmatmul.mubr.msk.f32.gmra.mxu1 %vm107_vm0, %v1857_v10  ;;  %1489 = vmatprep.subr.mxu1 %v627_v55  ;;  %v812_v10 = vld [vmem:[#allocation10 + $0x58] sm:$0xff] }
 0x1ff   :  { %1490 = vmatpush3.msra.mxu1 %v627_v55  ;;  %1493 = vmatprep.mubr.msk.f32.mxu1 %vm107_vm0, %v1861_v11  ;;  %v811_v11 = vld [vmem:[#allocation10 + $0x50] sm:$0xff] }
 0x200   :  { %1491 = vmatprep.subr.mxu1 %v626_v53 }
 0x201   :  { %1492 = vmatpush3.msra.mxu1 %v626_v53 }
 0x202   :  { %1494 = vmatmul.mubr.msk.f32.vlgmr.msra.gmra.mxu1 %vm107_vm0, %v1870_v13  ;;  %1499 = vmatprep.subr.mxu1 %v816_v60  ;;  %v810_v13 = vld [vmem:[#allocation10 + $0x48] sm:$0xff] }
 0x203   :  { %1496 = vmatprep.mubr.msk.f32.mxu1 %vm107_vm0, %v1873_v15  ;;  %1500 = vmatpush3.msra.mxu1 %v816_v60  ;;  %v809_v15 = vld [vmem:[#allocation10 + $0x40] sm:$0xff] }
 0x204   :  { %1501 = vmatprep.subr.mxu1 %v815_v61 }
 0x205   :  { %1502 = vmatpush3.msra.mxu1 %v815_v61 }
 0x206   :  { %1497 = vmatmul.mubr.msk.f32.gmra.mxu1 %vm107_vm0, %v1880_v18  ;;  %1503 = vmatprep.subr.mxu1 %v814_v7  ;;  %v806_v18 = vld [vmem:[#allocation10 + $0x28] sm:$0xff] }
 0x207   :  { %1504 = vmatpush3.msra.mxu1 %v814_v7 }
 0x208   :  { %1505 = vmatprep.subr.mxu1 %v813_v8 }
 0x209   :  { %1506 = vmatpush3.msra.mxu1 %v813_v8 }
 0x20a   :  { %1507 = vmatprep.subr.mxu1 %v812_v10 }
 0x20b   :  { %1508 = vmatpush3.msra.mxu1 %v812_v10 }
 0x20c   :  { %1509 = vmatprep.subr.mxu1 %v811_v11 }
 0x20d   :  { %1510 = vmatpush3.msra.mxu1 %v811_v11 }
 0x20e   :  { %1511 = vmatprep.subr.mxu1 %v810_v13 }
 0x20f   :  { %1512 = vmatpush3.msra.mxu1 %v810_v13 }
 0x210   :  { %1513 = vmatprep.subr.mxu1 %v809_v15 }
 0x211   :  { %1514 = vmatpush3.msra.mxu1 %v809_v15 }
 0x212   :  { %1515 = vmatprep.subr.mxu1 %v808_v62 }
 0x213   :  { %1516 = vmatpush3.msra.mxu1 %v808_v62 }
 0x214   :  { %1517 = vmatprep.subr.mxu1 %v807_v63 }
 0x215   :  { %1518 = vmatpush3.msra.mxu1 %v807_v63 }
 0x216   :  { %1519 = vmatprep.subr.mxu1 %v806_v18 }
 0x217   :  { %1520 = vmatpush3.msra.mxu1 %v806_v18 }
 0x218   :  { %1521 = vmatprep.subr.mxu1 %v805_v2 }
 0x219   :  { %1522 = vmatpush3.msra.mxu1 %v805_v2 }
 0x21a   :  { %1523 = vmatprep.subr.mxu1 %v804_v5 }
 0x21b   :  { %1524 = vmatpush3.msra.mxu1 %v804_v5 }
 0x21c   :  { %1525 = vmatprep.subr.mxu1 %v803_v6 }
 0x21d   :  { %1526 = vmatpush3.msra.mxu1 %v803_v6 }
 0x21e   :  { %1527 = vmatprep.subr.mxu1 %v802_v9 }
 0x21f   :  { %1528 = vmatpush3.msra.mxu1 %v802_v9 }
 0x220   :  { %1529 = vmatprep.subr.mxu1 %v801_v12 }
 0x221   :  { %1530 = vmatpush3.msra.mxu1 %v801_v12 }
 0x222   :  { %1575 = vmatprep.subr.mxu1 %v1034_v14 }
 0x2b1   :  { %v1571_v42 = vpop.f32.mrf.mxu0 }
 0x2b3   :  { %v995_v46 = vpop.f32.mrf.mxu0 }
 0x2b5   :  { %v1574_v51 = vpop.f32.mrf.mxu0 }
 0x2b7   :  { %v1005_v60 = vpop.f32.mrf.mxu0 }
 0x2ba   :  { %v1481_v16 = vpop.f32.mrf.mxu1 }
 0x2bc   :  { %v696_v17 = vpop.f32.mrf.mxu1 }
 0x2bd   :  { %1531 = vmatprep.mubr.f32.mxu1 %v696_v17 }
 0x2be   :  { %v1484_v20 = vpop.f32.mrf.mxu1  ;;  %1532 = vmatmul.mubr.f32.vlgmr.msra.gmra.mxu1 %v1481_v16 }
 0x2bf   :  { %1576 = vmatpush3.msra.mxu1 %v1034_v14 }
 0x2c0   :  { %1577 = vmatprep.subr.mxu1 %v1033_v19  ;;  %v706_v22 = vpop.f32.mrf.mxu1 }
 0x2c1   :  { %1578 = vmatpush3.msra.mxu1 %v1033_v19  ;;  %1534 = vmatprep.mubr.f32.mxu1 %v706_v22 }
 0x2c2   :  { %1579 = vmatprep.subr.mxu1 %v1032_v21  ;;  %1535 = vmatmul.mubr.f32.gmra.mxu1 %v1484_v20  ;;  %v1495_v24 = vpop.f32.mrf.mxu1 }
 0x2c3   :  { %1580 = vmatpush3.msra.mxu1 %v1032_v21 }
 0x2c4   :  { %1581 = vmatprep.subr.mxu1 %v1031_v23  ;;  %v781_v26 = vpop.f32.mrf.mxu1 }
 0x2c5   :  { %1582 = vmatpush3.msra.mxu1 %v1031_v23  ;;  %1607 = vmatprep.mubr.f32.mxu1 %v781_v26 }
 0x2c6   :  { %1583 = vmatprep.subr.mxu1 %v1030_v25  ;;  %v1498_v37 = vpop.f32.mrf.mxu1 }
 0x2c7   :  { %1584 = vmatpush3.msra.mxu1 %v1030_v25 }
 0x2c8   :  { %1585 = vmatprep.subr.mxu1 %v1029_v27  ;;  %v791_v39 = vpop.f32.mrf.mxu1 }
 0x2c9   :  { %1586 = vmatpush3.msra.mxu1 %v1029_v27 }
 0x2ca   :  { %1587 = vmatprep.subr.mxu1 %v1028_v28 }
 0x2cb   :  { %1588 = vmatpush3.msra.mxu1 %v1028_v28 }
 0x2cc   :  { %1589 = vmatprep.subr.mxu1 %v1027_v29 }
 0x2cd   :  { %1590 = vmatpush3.msra.mxu1 %v1027_v29 }
 0x2ce   :  { %1591 = vmatprep.subr.mxu1 %v1026_v30 }
 0x2cf   :  { %1592 = vmatpush3.msra.mxu1 %v1026_v30 }
 0x2d0   :  { %1593 = vmatprep.subr.mxu1 %v1025_v31 }
 0x2d1   :  { %1594 = vmatpush3.msra.mxu1 %v1025_v31 }
 0x2d2   :  { %1595 = vmatprep.subr.mxu1 %v1024_v32 }
 0x2d3   :  { %1596 = vmatpush3.msra.mxu1 %v1024_v32 }
 0x2d4   :  { %1597 = vmatprep.subr.mxu1 %v1023_v33 }
 0x2d5   :  { %1598 = vmatpush3.msra.mxu1 %v1023_v33 }
 0x2d6   :  { %1599 = vmatprep.subr.mxu1 %v1022_v34 }
 0x2d7   :  { %1600 = vmatpush3.msra.mxu1 %v1022_v34 }
 0x2d8   :  { %1601 = vmatprep.subr.mxu1 %v1021_v35 }
 0x2d9   :  { %1602 = vmatpush3.msra.mxu1 %v1021_v35 }
 0x2da   :  { %1603 = vmatprep.subr.mxu1 %v1020_v36 }
 0x2db   :  { %1604 = vmatpush3.msra.mxu1 %v1020_v36 }
 0x2dc   :  { %1605 = vmatprep.subr.mxu1 %v1019_v38 }
 0x2dd   :  { %1606 = vmatpush3.msra.mxu1 %v1019_v38 }
 0x2de   :  { %1608 = vmatmul.mubr.f32.vlgmr.msra.gmra.mxu1 %v1495_v24 }
 0x2df   :  { %1610 = vmatprep.mubr.f32.mxu1 %v791_v39 }
 0x2e2   :  { %1611 = vmatmul.mubr.f32.gmra.mxu1 %v1498_v37 }
 0x37e   :  { %v1533_v40 = vpop.f32.mrf.mxu1 }
 0x37f   :  { %v909_v45 = vadd.f32 %v1533_v40, %v1176_v43 }
 0x380   :  { %v883_v41 = vpop.f32.mrf.mxu1 }
 0x381   :  { %v908_v47 = vadd.f32 %v1176_v43, %v883_v41  ;;  %v1015_v50 = vadd.f32 %v1571_v42, %v909_v45 }
 0x382   :  { %v1536_v44 = vpop.f32.mrf.mxu1 }
 0x383   :  { %v911_v49 = vadd.f32 %v1536_v44, %v1176_v43  ;;  %v1014_v55 = vadd.f32 %v995_v46, %v908_v47 }
 0x384   :  { %v893_v48 = vpop.f32.mrf.mxu1 }
 0x385   :  { %v910_v53 = vadd.f32 %v1176_v43, %v893_v48  ;;  %v1017_v59 = vadd.f32 %v1574_v51, %v911_v49 }
 0x387   :  { %v1016_v11 = vadd.f32 %v1005_v60, %v910_v53 }
 0x39e   :  { %v1609_v52 = vpop.f32.mrf.mxu1 }
 0x39f   :  { %v1121_v54 = vadd.f32 %v1609_v52, %v1015_v50 }
 0x3a0   :  { %v1101_v56 = vpop.f32.mrf.mxu1 }
 0x3a1   :  { %v1125_v57 = vmax.f32 %v1121_v54, 0.0  ;;  %v1120_v58 = vadd.f32 %v1101_v56, %v1014_v55 }
 0x3a2   :  { %v1612_v61 = vpop.f32.mrf.mxu1 }
 0x3a3   :  { %v1129_v7 = vadd.f32 %v1125_v57, %v1835_v3  ;;  %v1124_v8 = vmax.f32 %v1120_v58, 0.0  ;;  %v1123_v10 = vadd.f32 %v1612_v61, %v1017_v59 }
 0x3a4   :  { %v1111_v13 = vpop.f32.mrf.mxu1 }
 0x3a5   :  { %v1133_v15 = vmax.f32 %v1129_v7, 0.0  ;;  %v1128_v62 = vadd.f32 %v1124_v8, %v1837_v4  ;;  %v1127_v63 = vmax.f32 %v1123_v10, 0.0  ;;  %v1122_v18 = vadd.f32 %v1111_v13, %v1016_v11 }
 0x3a7   :  { %1137 = vst [vmem:[#allocation11 + $0x8] sm:$0xff] %v1133_v15  ;;  %v1132_v2 = vmax.f32 %v1128_v62, 0.0  ;;  %v1131_v5 = vadd.f32 %v1127_v63, %v1827_v0  ;;  %v1126_v6 = vmax.f32 %v1122_v18, 0.0 }
 0x3a9   :  { %1136 = vst [vmem:[#allocation11] sm:$0xff] %v1132_v2  ;;  %v1135_v9 = vmax.f32 %v1131_v5, 0.0  ;;  %v1130_v3 = vadd.f32 %v1126_v6, %v1829_v1 }
 0x3ab   :  { %1139 = vst [vmem:[#allocation11 + $0x18] sm:$0xff] %v1135_v9  ;;  %v1134_v12 = vmax.f32 %v1130_v3, 0.0 }
 0x3ad   :  { %1138 = vst [vmem:[#allocation11 + $0x10] sm:$0xff] %v1134_v12 }
 0x3ae   :  { %1732 = shalt.err (!%p1729_p1)
}
 0x3af   :  { %1151 = dma.vmem_to_hbm [thread:$0]  %s1146_s26, 512, %s1926_s7, [#allocation4], %s1751_s29, %s1751_s29, %s1752_s30  }
 0x3b0   :  { %1747 = dma.done.wait [#allocation4], 512  }
 0x3b1   :  { %1748 = vsyncadd [#allocation4], 4294966784 }
 0x3b2   :  { %1155 = vsyncpa [#allocation3], 1 }
 0x3b3   :  { %1156 = vsyncpa [#allocation6], 1 }
 0x3b4   :  { %1157 = vsyncpa [#allocation9], 1 }
 0x3b5   :  { %1158 = vsyncpa [#allocation4], 1 }

</bundles_post_ra>
